<compile_context>
chip_gen: v5e
topology: v5e:2x2
jax: 0.10.0
libtpu: 0.0.40
codegen_flags: <defaults>
</compile_context>

<pallas_src>
import functools
import math

import jax
import jax.numpy as jnp
from jax import lax
from jax.experimental import pallas as pl
from jax.experimental.pallas import tpu as pltpu

EPS = 1e-5           # PyTorch BatchNorm1d default eps
EXPANSION = 4
LANE = 128


# ----------------------------- small helpers ---------------------------------

def _pad128(c):
    return max(LANE, ((c + LANE - 1) // LANE) * LANE)


def _pad2d(a, rows, cols):
    return jnp.pad(a, ((0, rows - a.shape[0]), (0, cols - a.shape[1])))


def _colstats(h):
    """Per-channel [sum ; sum of squares] of a (T, C) f32 tile -> (2, C)."""
    return jnp.concatenate(
        [jnp.sum(h, axis=0, keepdims=True),
         jnp.sum(h * h, axis=0, keepdims=True)], axis=0)


def _bn_scale_shift(stats, gamma, beta, count, c_pad):
    """Fold training-mode BN into per-channel scale/shift (tiny vector op)."""
    mu = stats[0] / count
    var = jnp.maximum(stats[1] / count - mu * mu, 0.0)
    g = jnp.zeros((c_pad,), jnp.float32).at[: gamma.shape[0]].set(gamma)
    b = jnp.zeros((c_pad,), jnp.float32).at[: beta.shape[0]].set(beta)
    scale = g * lax.rsqrt(var + EPS)
    shift = b - mu * scale
    return scale.reshape(1, c_pad), shift.reshape(1, c_pad)


def _vmem_limit_bytes():
    """Per-generation scoped-VMEM budget: v5e/v6e have 128 MiB physical VMEM,
    v7x only 64 MiB per TensorCore — stay conservative when unsure."""
    try:
        kind = jax.devices()[0].device_kind.lower()
    except Exception:
        kind = ""
    if "v5" in kind or "v6" in kind:
        return 100 * 1024 * 1024
    return 48 * 1024 * 1024


def _pick_tile_rows(M, L, per_row_bytes, budget_bytes):
    """Pick a row tile T that is a multiple of lcm(L, 16) (so the k=3 halo never
    crosses a tile and bf16 sublane packing stays aligned), divides the padded
    row count Mp, and fits the streaming VMEM budget.  Returns (T, Mp)."""
    base = (L * 16) // math.gcd(L, 16)
    Mp = -(-M // base) * base
    cap = max(base, min(budget_bytes // max(per_row_bytes, 1), 4096))
    best, t = base, base
    limit = min(cap, Mp)
    while t <= limit:
        if Mp % t == 0:
            best = t
        t += base
    return best, Mp


# ------------------------------- kernels --------------------------------------

def _pass1_proj_kernel(x_ref, wcat_ref, h1_ref, sc_ref, st1_ref, sts_ref):
    """conv1 + projection-shortcut conv fused into ONE MXU matmul; per-tile stats."""
    out = jnp.dot(x_ref[...], wcat_ref[...], preferred_element_type=jnp.float32)
    cm = h1_ref.shape[1]
    h1 = out[:, :cm]           # lane-aligned slices (cm is a multiple of 128)
    sc = out[:, cm:]
    h1_ref[...] = h1.astype(h1_ref.dtype)
    sc_ref[...] = sc.astype(sc_ref.dtype)
    st1_ref[...] = _colstats(h1)
    sts_ref[...] = _colstats(sc)


def _pass1_kernel(x_ref, w1_ref, h1_ref, st1_ref):
    """conv1 (1x1) only (identity shortcut); per-tile channel stats."""
    h1 = jnp.dot(x_ref[...], w1_ref[...], preferred_element_type=jnp.float32)
    h1_ref[...] = h1.astype(h1_ref.dtype)
    st1_ref[...] = _colstats(h1)


def _pass2_kernel(h1_ref, w2_ref, scale_ref, shift_ref, valid_ref,
                  not_first_ref, not_last_ref, h2_ref, st2_ref):
    """bn1(scale/shift)+relu, then k=3 conv2 as three accumulating MXU dots.
    Row shifts via pltpu.roll; precomputed (T,1) masks kill taps crossing a
    sequence boundary; the valid mask zeroes padded rows out of the stats."""
    T = h1_ref.shape[0]
    h1a = jnp.maximum(h1_ref[...].astype(jnp.float32) * scale_ref[...]
                      + shift_ref[...], 0.0) * valid_ref[...]
    prev = pltpu.roll(h1a, shift=1, axis=0) * not_first_ref[...]     # h1a[l-1]
    nxt = pltpu.roll(h1a, shift=T - 1, axis=0) * not_last_ref[...]   # h1a[l+1]
    h2 = jnp.dot(h1a.astype(jnp.bfloat16), w2_ref[1],
                 preferred_element_type=jnp.float32)
    h2 = h2 + jnp.dot(prev.astype(jnp.bfloat16), w2_ref[0],
                      preferred_element_type=jnp.float32)
    h2 = h2 + jnp.dot(nxt.astype(jnp.bfloat16), w2_ref[2],
                      preferred_element_type=jnp.float32)
    h2_ref[...] = h2.astype(h2_ref.dtype)
    st2_ref[...] = _colstats(h2)


def _pass3_kernel(h2_ref, w3_ref, scale_ref, shift_ref, valid_ref,
                  h3_ref, st3_ref):
    """bn2(scale/shift)+relu, conv3 (1x1); per-tile channel stats."""
    h2a = jnp.maximum(h2_ref[...].astype(jnp.float32) * scale_ref[...]
                      + shift_ref[...], 0.0) * valid_ref[...]
    h3 = jnp.dot(h2a.astype(jnp.bfloat16), w3_ref[...],
                 preferred_element_type=jnp.float32)
    h3_ref[...] = h3.astype(h3_ref.dtype)
    st3_ref[...] = _colstats(h3)


def _pass4_kernel(project, h3_ref, scale3_ref, shift3_ref, *rest):
    """bn3 + shortcut(-bn) + add + relu.  Pure normalize pass (parallel grid)."""
    if project:
        sc_ref, scale_s_ref, shift_s_ref, o_ref = rest
        shortcut = (sc_ref[...].astype(jnp.float32) * scale_s_ref[...]
                    + shift_s_ref[...])
    else:
        x_ref, o_ref = rest
        shortcut = x_ref[...].astype(jnp.float32)
    o_ref[...] = jnp.maximum(
        h3_ref[...].astype(jnp.float32) * scale3_ref[...] + shift3_ref[...]
        + shortcut, 0.0)


# ------------------------------- wrapper ---------------------------------------

def bottleneck_forward_nlc(x_nlc, p, stride=1, tile_rows=None):
    """Channels-last entry point: x_nlc (N, L, C_in) -> (N, L, 4*C_out)."""
    # TODO(synk): stride > 1 (strided conv2 / strided shortcut) not implemented.
    assert stride == 1
    N, L, Cin = x_nlc.shape
    Cm = p["conv1"].shape[0]
    Ce = p["conv3"].shape[0]
    project = (stride != 1) or (Cin != Ce)
    M = N * L

    cin_p, cm_p, ce_p = _pad128(Cin), _pad128(Cm), _pad128(Ce)

    # Streaming bytes per row of the widest pass (bf16, double-buffered) plus a
    # rough allowance for f32 in-kernel temporaries; used to bound the tile.
    stream = max(cin_p + cm_p + (ce_p if project else 0),   # pass 1
                 2 * cm_p,                                   # pass 2
                 cm_p + ce_p,                                # pass 3
                 3 * ce_p)                                   # pass 4
    per_row = 2 * 2 * stream + 4 * 4 * max(cm_p + ce_p, 3 * cm_p)
    vmem_limit = _vmem_limit_bytes()

    base = (L * 16) // math.gcd(L, 16)
    if tile_rows is None:
        T, Mp = _pick_tile_rows(M, L, per_row, vmem_limit // 2)
    else:
        T = tile_rows
        assert T % base == 0, (T, base)
        Mp = -(-M // T) * T
    n_tiles = Mp // T

    # ---- host-side packing: channels-last, lane-padded, bf16 ----
    x2d = x_nlc.reshape(M, Cin).astype(jnp.bfloat16)
    if Mp != M or cin_p != Cin:
        x2d = jnp.pad(x2d, ((0, Mp - M), (0, cin_p - Cin)))
    w1 = _pad2d(p["conv1"][:, :, 0].T, cin_p, cm_p).astype(jnp.bfloat16)
    w3 = _pad2d(p["conv3"][:, :, 0].T, cm_p, ce_p).astype(jnp.bfloat16)
    w2 = jnp.stack([_pad2d(p["conv2"][:, :, k].T, cm_p, cm_p) for k in range(3)]
                   ).astype(jnp.bfloat16)

    # Sequence-boundary masks (identical for every tile since T % L == 0 and
    # tiles start on sequence boundaries) and the padded-row validity mask.
    pos = jnp.arange(T, dtype=jnp.int32) % L
    not_first = (pos != 0).astype(jnp.float32).reshape(T, 1)
    not_last = (pos != L - 1).astype(jnp.float32).reshape(T, 1)
    valid = (jnp.arange(Mp) < M).astype(jnp.float32).reshape(Mp, 1)

    row = lambda c: pl.BlockSpec((T, c), lambda i: (i, 0))
    col = lambda: pl.BlockSpec((T, 1), lambda i: (i, 0))
    fixed = lambda r, c: pl.BlockSpec((r, c), lambda i: (0, 0))
    stat = lambda c: pl.BlockSpec((None, 2, c), lambda i: (i, 0, 0))

    cp = pltpu.CompilerParams(dimension_semantics=("parallel",),
                              vmem_limit_bytes=vmem_limit)

    # ---- pass 1: conv1 (+ fused shortcut conv) + per-tile stats ----
    if project:
        ws = _pad2d(p["sc_conv"][:, :, 0].T, cin_p, ce_p).astype(jnp.bfloat16)
        wcat = jnp.concatenate([w1, ws], axis=1)
        h1pre, scpre, st1_t, sts_t = pl.pallas_call(
            _pass1_proj_kernel,
            grid=(n_tiles,),
            in_specs=[row(cin_p), fixed(cin_p, cm_p + ce_p)],
            out_specs=(row(cm_p), row(ce_p), stat(cm_p), stat(ce_p)),
            out_shape=(jax.ShapeDtypeStruct((Mp, cm_p), jnp.bfloat16),
                       jax.ShapeDtypeStruct((Mp, ce_p), jnp.bfloat16),
                       jax.ShapeDtypeStruct((n_tiles, 2, cm_p), jnp.float32),
                       jax.ShapeDtypeStruct((n_tiles, 2, ce_p), jnp.float32)),
            compiler_params=cp,
        )(x2d, wcat)
        st_sc = jnp.sum(sts_t, axis=0)
    else:
        h1pre, st1_t = pl.pallas_call(
            _pass1_kernel,
            grid=(n_tiles,),
            in_specs=[row(cin_p), fixed(cin_p, cm_p)],
            out_specs=(row(cm_p), stat(cm_p)),
            out_shape=(jax.ShapeDtypeStruct((Mp, cm_p), jnp.bfloat16),
                       jax.ShapeDtypeStruct((n_tiles, 2, cm_p), jnp.float32)),
            compiler_params=cp,
        )(x2d, w1)
    st1 = jnp.sum(st1_t, axis=0)
    scale1, shift1 = _bn_scale_shift(st1, p["bn1_g"], p["bn1_b"], M, cm_p)

    # ---- pass 2: bn1+relu, roll-shifted k=3 conv2 (3 accumulating dots) ----
    h2pre, st2_t = pl.pallas_call(
        _pass2_kernel,
        grid=(n_tiles,),
        in_specs=[row(cm_p),
                  pl.BlockSpec((3, cm_p, cm_p), lambda i: (0, 0, 0)),
                  fixed(1, cm_p), fixed(1, cm_p),
                  col(), fixed(T, 1), fixed(T, 1)],
        out_specs=(row(cm_p), stat(cm_p)),
        out_shape=(jax.ShapeDtypeStruct((Mp, cm_p), jnp.bfloat16),
                   jax.ShapeDtypeStruct((n_tiles, 2, cm_p), jnp.float32)),
        compiler_params=cp,
    )(h1pre, w2, scale1, shift1, valid, not_first, not_last)
    st2 = jnp.sum(st2_t, axis=0)
    scale2, shift2 = _bn_scale_shift(st2, p["bn2_g"], p["bn2_b"], M, cm_p)

    # ---- pass 3: bn2+relu, conv3 + per-tile stats ----
    h3pre, st3_t = pl.pallas_call(
        _pass3_kernel,
        grid=(n_tiles,),
        in_specs=[row(cm_p), fixed(cm_p, ce_p), fixed(1, cm_p), fixed(1, cm_p),
                  col()],
        out_specs=(row(ce_p), stat(ce_p)),
        out_shape=(jax.ShapeDtypeStruct((Mp, ce_p), jnp.bfloat16),
                   jax.ShapeDtypeStruct((n_tiles, 2, ce_p), jnp.float32)),
        compiler_params=cp,
    )(h2pre, w3, scale2, shift2, valid)
    st3 = jnp.sum(st3_t, axis=0)
    scale3, shift3 = _bn_scale_shift(st3, p["bn3_g"], p["bn3_b"], M, ce_p)

    # ---- pass 4: bn3 + shortcut + relu (fully parallel) ----
    if project:
        scale_s, shift_s = _bn_scale_shift(st_sc, p["sc_g"], p["sc_b"], M, ce_p)
        args4 = (h3pre, scale3, shift3, scpre, scale_s, shift_s)
        in_specs4 = [row(ce_p), fixed(1, ce_p), fixed(1, ce_p),
                     row(ce_p), fixed(1, ce_p), fixed(1, ce_p)]
    else:
        # identity shortcut: Cin == Ce so cin_p == ce_p and x2d is already padded
        args4 = (h3pre, scale3, shift3, x2d)
        in_specs4 = [row(ce_p), fixed(1, ce_p), fixed(1, ce_p), row(ce_p)]

    out2d = pl.pallas_call(
        functools.partial(_pass4_kernel, project),
        grid=(n_tiles,),
        in_specs=in_specs4,
        out_specs=row(ce_p),
        out_shape=jax.ShapeDtypeStruct((Mp, ce_p), jnp.float32),
        compiler_params=cp,
    )(*args4)

    # TODO(synk): when chaining blocks, fuse this pass-4 normalize+add+relu into
    # the next block's pass 1 to save one full HBM round trip of the activation.
    out = out2d if (Mp == M and ce_p == Ce) else out2d[:M, :Ce]
    return out.reshape(N, L, Ce)


def bottleneck_forward(x_ncl, p, stride=1, tile_rows=None):
    """PyTorch-layout entry point: x_ncl (N, C_in, L) -> (N, 4*C_out, L).
    The transposes exist only for NCL parity with the PyTorch module; chains of
    blocks should stay channels-last and call bottleneck_forward_nlc directly."""
    y = bottleneck_forward_nlc(jnp.transpose(x_ncl, (0, 2, 1)), p,
                               stride=stride, tile_rows=tile_rows)
    return jnp.transpose(y, (0, 2, 1))


# ----------------------- parameters & pure-JAX reference -----------------------

def make_params(key, in_channels, out_channels):
    """Deterministic synthetic parameters matching the module's PyTorch shapes."""
    ce = EXPANSION * out_channels
    ks = jax.random.split(key, 12)

    def conv_w(k, cout, cin, ksz):
        return 0.2 * jax.random.normal(k, (cout, cin, ksz), jnp.float32)

    def bn(kg, kb, c):
        g = 1.0 + 0.1 * jax.random.normal(kg, (c,), jnp.float32)
        b = 0.1 * jax.random.normal(kb, (c,), jnp.float32)
        return g, b

    g1, b1 = bn(ks[3], ks[4], out_channels)
    g2, b2 = bn(ks[5], ks[6], out_channels)
    g3, b3 = bn(ks[7], ks[8], ce)
    gs, bs = bn(ks[10], ks[11], ce)
    return dict(
        conv1=conv_w(ks[0], out_channels, in_channels, 1),
        conv2=conv_w(ks[1], out_channels, out_channels, 3),
        conv3=conv_w(ks[2], ce, out_channels, 1),
        sc_conv=conv_w(ks[9], ce, in_channels, 1),
        bn1_g=g1, bn1_b=b1, bn2_g=g2, bn2_b=b2, bn3_g=g3, bn3_b=b3,
        sc_g=gs, sc_b=bs,
    )


def reference_forward(x, p, stride=1):
    """Pure-JAX reference mirroring the PyTorch forward (training-mode BN)."""
    def conv1d(h, w, s=1, pad=0):
        return lax.conv_general_dilated(
            h, w, window_strides=(s,), padding=[(pad, pad)],
            dimension_numbers=("NCH", "OIH", "NCH"))

    def bn(h, g, b):
        mu = h.mean(axis=(0, 2), keepdims=True)
        var = ((h - mu) ** 2).mean(axis=(0, 2), keepdims=True)
        return (h - mu) / jnp.sqrt(var + EPS) * g[None, :, None] + b[None, :, None]

    out = jax.nn.relu(bn(conv1d(x, p["conv1"]), p["bn1_g"], p["bn1_b"]))
    out = jax.nn.relu(bn(conv1d(out, p["conv2"], s=stride, pad=1), p["bn2_g"], p["bn2_b"]))
    out = bn(conv1d(out, p["conv3"]), p["bn3_g"], p["bn3_b"])
    Cin, Ce = x.shape[1], p["conv3"].shape[0]
    if stride != 1 or Cin != Ce:
        sc = bn(conv1d(x, p["sc_conv"], s=stride), p["sc_g"], p["sc_b"])
    else:
        sc = x
    return jax.nn.relu(out + sc)


if __name__ == "__main__":
    key = jax.random.PRNGKey(0)
    kx1, kp1, kx2, kp2, kx3, kp3 = jax.random.split(key, 6)
    # Tolerances account for bf16 inter-pass activations (stats stay f32).
    TOL = dict(atol=1e-1, rtol=1e-1)

    # Config 1: projection shortcut (Cin != 4*Cout). tile_rows=16 -> 2-tile grid.
    N, Cin, L, Cout = 2, 4, 16, 4
    x1 = jax.random.normal(kx1, (N, Cin, L), jnp.float32)
    p1 = make_params(kp1, Cin, Cout)
    y1 = jax.block_until_ready(bottleneck_forward(x1, p1, tile_rows=16))
    y1_ref = reference_forward(x1, p1)
    assert y1.shape == (N, EXPANSION * Cout, L), y1.shape
    assert jnp.allclose(y1, y1_ref, **TOL), \
        f"proj max_err={float(jnp.max(jnp.abs(y1 - y1_ref)))}"

    # Config 2: identity shortcut (Cin == 4*Cout) — exercises the non-project path.
    N2, Cin2, L2, Cout2 = 2, 16, 16, 4
    x2 = jax.random.normal(kx2, (N2, Cin2, L2), jnp.float32)
    p2 = make_params(kp2, Cin2, Cout2)
    y2 = jax.block_until_ready(bottleneck_forward(x2, p2, tile_rows=16))
    y2_ref = reference_forward(x2, p2)
    assert y2.shape == (N2, EXPANSION * Cout2, L2), y2.shape
    assert jnp.allclose(y2, y2_ref, **TOL), \
        f"identity max_err={float(jnp.max(jnp.abs(y2 - y2_ref)))}"

    # Config 3: awkward L (12) -> exercises row padding + valid-mask stats path.
    N3, Cin3, L3, Cout3 = 1, 8, 12, 4
    x3 = jax.random.normal(kx3, (N3, Cin3, L3), jnp.float32)
    p3 = make_params(kp3, Cin3, Cout3)
    y3 = jax.block_until_ready(bottleneck_forward(x3, p3))
    y3_ref = reference_forward(x3, p3)
    assert y3.shape == (N3, EXPANSION * Cout3, L3), y3.shape
    assert jnp.allclose(y3, y3_ref, **TOL), \
        f"padded max_err={float(jnp.max(jnp.abs(y3 - y3_ref)))}"

    print("KERNEL_OK")
</pallas_src>

<mosaic_0001>
module attributes {stable_mosaic.version = 11 : i64} {
  func.func @_pass1_proj_kernel(%arg0: i32, %arg1: memref<16x128xbf16, #tpu.memory_space<vmem>>, %arg2: memref<128x256xbf16, #tpu.memory_space<vmem>>, %arg3: memref<16x128xbf16, #tpu.memory_space<vmem>>, %arg4: memref<16x128xbf16, #tpu.memory_space<vmem>>, %arg5: memref<1x2x128xf32, #tpu.memory_space<vmem>>, %arg6: memref<1x2x128xf32, #tpu.memory_space<vmem>>) attributes {dimension_semantics = [#tpu.dimension_semantics<parallel>], iteration_bounds = array<i64: 2>, scalar_prefetch = 0 : i64, scratch_operands = 0 : i64, tpu.core_type = #tpu.core_type<tc>, window_params = [{transform_indices = @transform_0, window_bounds = array<i64: 16, 128>}, {pipeline_mode = #tpu.pipeline_mode<synchronous>, transform_indices = @transform_1, window_bounds = array<i64: 128, 256>}, {transform_indices = @transform_2, window_bounds = array<i64: 16, 128>}, {transform_indices = @transform_3, window_bounds = array<i64: 16, 128>}, {transform_indices = @transform_4, window_bounds = array<i64: 1, 2, 128>}, {transform_indices = @transform_5, window_bounds = array<i64: 1, 2, 128>}]} {
    %c0 = arith.constant 0 : index
    %c0_0 = arith.constant 0 : index
    %0 = vector.load %arg1[%c0, %c0_0] : memref<16x128xbf16, #tpu.memory_space<vmem>>, vector<16x128xbf16>
    %c0_1 = arith.constant 0 : index
    %c0_2 = arith.constant 0 : index
    %1 = vector.load %arg2[%c0_1, %c0_2] : memref<128x256xbf16, #tpu.memory_space<vmem>>, vector<128x256xbf16>
    %cst = arith.constant dense<0.000000e+00> : vector<16x256xf32>
    %2 = tpu.matmul %0, %1, %cst {dimension_numbers = #tpu.dot_dimension_numbers<[1], [0], [0], [1], [0, 0, 1, 1], [], []>} : vector<16x128xbf16>, vector<128x256xbf16>, vector<16x256xf32> -> vector<16x256xf32>
    %3 = vector.extract_strided_slice %2 {offsets = [0, 0], sizes = [16, 128], strides = [1, 1]} : vector<16x256xf32> to vector<16x128xf32>
    %4 = vector.extract_strided_slice %2 {offsets = [0, 128], sizes = [16, 128], strides = [1, 1]} : vector<16x256xf32> to vector<16x128xf32>
    %5 = arith.truncf %3 : vector<16x128xf32> to vector<16x128xbf16>
    %c0_3 = arith.constant 0 : index
    %c0_4 = arith.constant 0 : index
    %6 = vector.load %arg3[%c0_3, %c0_4] : memref<16x128xbf16, #tpu.memory_space<vmem>>, vector<16x128xbf16>
    tpu.vector_store %arg3[%c0_3, %c0_4], %5 {strides = array<i32>} : memref<16x128xbf16, #tpu.memory_space<vmem>>, vector<16x128xbf16>,
    %7 = arith.truncf %4 : vector<16x128xf32> to vector<16x128xbf16>
    %c0_5 = arith.constant 0 : index
    %c0_6 = arith.constant 0 : index
    %8 = vector.load %arg4[%c0_5, %c0_6] : memref<16x128xbf16, #tpu.memory_space<vmem>>, vector<16x128xbf16>
    tpu.vector_store %arg4[%c0_5, %c0_6], %7 {strides = array<i32>} : memref<16x128xbf16, #tpu.memory_space<vmem>>, vector<16x128xbf16>,
    %cst_7 = arith.constant dense<0.000000e+00> : vector<128xf32>
    %9 = vector.multi_reduction <add>, %3, %cst_7 [0] : vector<16x128xf32> to vector<128xf32>
    %10 = vector.shape_cast %9 : vector<128xf32> to vector<1x128xf32>
    %11 = arith.mulf %3, %3 : vector<16x128xf32>
    %cst_8 = arith.constant dense<0.000000e+00> : vector<128xf32>
    %12 = vector.multi_reduction <add>, %11, %cst_8 [0] : vector<16x128xf32> to vector<128xf32>
    %13 = vector.shape_cast %12 : vector<128xf32> to vector<1x128xf32>
    %14 = tpu.concatenate %10, %13 in 0 : vector<1x128xf32>, vector<1x128xf32> -> vector<2x128xf32>
    %c0_9 = arith.constant 0 : index
    %c0_10 = arith.constant 0 : index
    %c0_11 = arith.constant 0 : index
    %15 = vector.load %arg5[%c0_9, %c0_10, %c0_11] : memref<1x2x128xf32, #tpu.memory_space<vmem>>, vector<1x2x128xf32>
    %16 = vector.shape_cast %15 : vector<1x2x128xf32> to vector<2x128xf32>
    %17 = vector.shape_cast %14 : vector<2x128xf32> to vector<1x2x128xf32>
    tpu.vector_store %arg5[%c0_9, %c0_10, %c0_11], %17 {strides = array<i32>} : memref<1x2x128xf32, #tpu.memory_space<vmem>>, vector<1x2x128xf32>,
    %cst_12 = arith.constant dense<0.000000e+00> : vector<128xf32>
    %18 = vector.multi_reduction <add>, %4, %cst_12 [0] : vector<16x128xf32> to vector<128xf32>
    %19 = vector.shape_cast %18 : vector<128xf32> to vector<1x128xf32>
    %20 = arith.mulf %4, %4 : vector<16x128xf32>
    %cst_13 = arith.constant dense<0.000000e+00> : vector<128xf32>
    %21 = vector.multi_reduction <add>, %20, %cst_13 [0] : vector<16x128xf32> to vector<128xf32>
    %22 = vector.shape_cast %21 : vector<128xf32> to vector<1x128xf32>
    %23 = tpu.concatenate %19, %22 in 0 : vector<1x128xf32>, vector<1x128xf32> -> vector<2x128xf32>
    %c0_14 = arith.constant 0 : index
    %c0_15 = arith.constant 0 : index
    %c0_16 = arith.constant 0 : index
    %24 = vector.load %arg6[%c0_14, %c0_15, %c0_16] : memref<1x2x128xf32, #tpu.memory_space<vmem>>, vector<1x2x128xf32>
    %25 = vector.shape_cast %24 : vector<1x2x128xf32> to vector<2x128xf32>
    %26 = vector.shape_cast %23 : vector<2x128xf32> to vector<1x2x128xf32>
    tpu.vector_store %arg6[%c0_14, %c0_15, %c0_16], %26 {strides = array<i32>} : memref<1x2x128xf32, #tpu.memory_space<vmem>>, vector<1x2x128xf32>,
    return
  }
  func.func @transform_0(%arg0: i32) -> (i32, i32) {
    %c0_i32 = arith.constant 0 : i32
    %c0_i32_0 = arith.constant 0 : i32
    return %arg0, %c0_i32 : i32, i32
  }
  func.func @transform_1(%arg0: i32) -> (i32, i32) {
    %c0_i32 = arith.constant 0 : i32
    %c0_i32_0 = arith.constant 0 : i32
    %c0_i32_1 = arith.constant 0 : i32
    return %c0_i32, %c0_i32_0 : i32, i32
  }
  func.func @transform_2(%arg0: i32) -> (i32, i32) {
    %c0_i32 = arith.constant 0 : i32
    %c0_i32_0 = arith.constant 0 : i32
    return %arg0, %c0_i32 : i32, i32
  }
  func.func @transform_3(%arg0: i32) -> (i32, i32) {
    %c0_i32 = arith.constant 0 : i32
    %c0_i32_0 = arith.constant 0 : i32
    return %arg0, %c0_i32 : i32, i32
  }
  func.func @transform_4(%arg0: i32) -> (i32, i32, i32) {
    %c0_i32 = arith.constant 0 : i32
    %c0_i32_0 = arith.constant 0 : i32
    %c0_i32_1 = arith.constant 0 : i32
    return %arg0, %c0_i32, %c0_i32_0 : i32, i32, i32
  }
  func.func @transform_5(%arg0: i32) -> (i32, i32, i32) {
    %c0_i32 = arith.constant 0 : i32
    %c0_i32_0 = arith.constant 0 : i32
    %c0_i32_1 = arith.constant 0 : i32
    return %arg0, %c0_i32, %c0_i32_0 : i32, i32, i32
  }
}

</mosaic_0001>

<bundles_post_ra>
// kernel: tpu_custom_call.1
= control target key start
LH: loop header
LB: loop body
LE: loop exit
PB: predicated region body
PF: predicated region fallthrough
CT: control target
= control target key end

     0   :  { %11 = vsyncpa [#allocation3], 0  ;;  %s1415_s0 = inlined_call_operand.hbm [shape: bf16[32,128], index: 0, kind: input, shape index: {}]   ;;  %s1416_s1 = inlined_call_operand.hbm [shape: bf16[128,256], index: 1, kind: input, shape index: {}]   ;;  %s1417_s2 = inlined_call_operand.hbm [shape: bf16[32,128], index: 2, kind: output, shape index: {0}]   ;;  %s1418_s3 = inlined_call_operand.hbm [shape: bf16[32,128], index: 3, kind: output, shape index: {1}]   ;;  %s1419_s4 = inlined_call_operand.hbm [shape: f32[2,2,128], index: 4, kind: output, shape index: {2}]   ;;  %s1420_s5 = inlined_call_operand.hbm [shape: f32[2,2,128], index: 5, kind: output, shape index: {3}]  }
   0x1   :  { %13 = vsyncpa [#allocation3 + $0x1], 0 }
   0x2   :  { %14 = vsyncpa [#allocation6], 0 }
   0x3   :  { %15 = vsyncpa [#allocation4], 0 }
   0x4   :  { %17 = vsyncpa [#allocation4 + $0x1], 0 }
   0x5   :  { %18 = vsyncpa [#allocation9], 0 }
   0x6   :  { %20 = vsyncpa [#allocation9 + $0x1], 0 }
   0x7   :  { %21 = vsyncpa [#allocation12], 0 }
   0x8   :  { %23 = vsyncpa [#allocation12 + $0x1], 0  ;;  %s1188_s18 = smov 0   ;;  %s1190_s19 = smov 0  }
   0x9   :  { %s1192_s20 = smov 0   ;;  %s1194_s21 = smov 0  }
   0xa LB: > { %s1209_s22 = sadd.s32 4294967295, %s1149_s21   ;;  %s1421_s23 = sadd.s32 4294967294, %s1149_s21   ;;  %s1149_s21 = sphi %s1194_s21, %s1434_s21   ;;  %s1145_s20 = sphi %s1192_s20, %s1433_s20   ;;  %s1141_s19 = sphi %s1190_s19, %s1432_s19   ;;  %s1137_s18 = sphi %s1188_s18, %s1431_s18  }
   0xb   : > { %p49_p0 = scmp.ne.s32.totalorder %s1141_s19, %s1137_s18  ;;  %p50_p1 = scmp.eq.s32.totalorder %s1209_s22, 0 }
   0xc   : > { %p94_p2 = scmp.eq.s32.totalorder %s1209_s22, 1  ;;  %p100_p3 = scmp.eq.s32.totalorder %s1421_s23, 1 }
   0xd   : > { %p1220_p4 = por %p50_p1, %p49_p0  ;;  %p726_p5 = scmp.ge.s32.totalorder %s1149_s21, 1 }
   0xe   : > { %p1225_p6 = por %p100_p3, %p49_p0  ;;  %p185_p7 = scmp.lt.s32.totalorder %s1149_s21, 3 }
   0xf   : > { %s196_s28 = sshll.u32 %s1416_s1, 4  ;;  %s1151_s30 = smov [#allocation5]   ;;  %s197_s28 = int_to_ptr.hbm [resolvable:$true] %s196_s28 }
  0x10   : > { %p1233_p8 = pnand %p726_p5, %p185_p7  ;;  %s198_s6 = sshll.u32 %s1151_s30, 4  ;;  %s199_s6 = int_to_ptr.vmem [resolvable:$true] %s198_s6 }
  0x11   : > { %s1243_s7 = sadd.s32 1, %s1149_s21   ;;  %s1152_s8 = smov 128  }
  0x12   : > { %p863_p9 = pneg %p1233_p8  ;;  %s1153_s9 = smov 8  }
  0x13   : > { %s33_s10 = ssub.s32 %s1149_s21, %s1243_s7  ;;  %s36_s11 = sadd.s32 1, %s1145_s20 }
  0x14   : > { %p864_p10 = pnand %p863_p9, %p50_p1  ;;  %p34_p12 = scmp.eq.s32.totalorder %s33_s10, 0 }
  0x15   : > { %p43_p13 = scmp.ne.s32.totalorder %s1145_s20, %s1141_s19  ;;  %p44_p0 = scmp.eq.s32.totalorder %s1149_s21, 0 }
  0x16   : > { %866 = dma.hbm_to_vmem [thread:$0]  (!%p864_p10), %s197_s28, 2048, %s199_s6, [#allocation6], %s1152_s8, %s1152_s8, %s1153_s9  }
  0x17   : > { %p885_p3 = scmp.lt.s32.totalorder %s1149_s21, 2  ;;  %p45_p5 = por %p44_p0, %p43_p13 }
  0x18   : > { %s1253_s12 = scalar_select %p34_p12, %s1145_s20, %s36_s11  }
  0x19   : > { %p1257_p7 = por %p94_p2, %p43_p13  ;;  %s212_s14 = sand.u32 1, %s1145_s20  }
  0x1a   : > { %s819_s15 = sshll.u32 %s1149_s21, 3  ;;  %s729_s16 = sshll.u32 %s212_s14, 3 }
  0x1b   : > { %s221_s27 = scalar_lea.hbm %s1415_s0, %s819_s15  ;;  %s216_s30 = scalar_lea.vmem [#allocation2], %s729_s16 }
  0x1c   : > { %s222_s28 = sshll.u32 %s221_s27, 4  ;;  %s224_s6 = sshll.u32 %s216_s30, 4  ;;  %s223_s28 = int_to_ptr.hbm [resolvable:$true] %s222_s28  ;;  %s225_s6 = int_to_ptr.vmem [resolvable:$true] %s224_s6 }
  0x1d   : > { %p1268_p9 = pnand %p885_p3, %p45_p5  ;;  %s213_s9 = scalar_lea.sflag [#allocation3], %s212_s14 }
  0x1e   : > { %s957_s10 = sshra.s32 %s223_s28, 4  ;;  %s964_s17 = scalar_lea.hbm %s1415_s0, 16  ;;  %s958_s10 = int_to_ptr.hbm [resolvable:$true] %s957_s10 }
  0x1f   : > { %s959_s11 = scalar_lea.hbm %s958_s10, 8  ;;  %p961_p10 = pneg %p1268_p9 }
  0x20   : > { %p960_p2 = scmp.ne.s32.totalorder %s958_s10, %s959_s11  ;;  %p965_p0 = scmp.lt.s32.totalorder %s958_s10, %s1415_s0 }
  0x21   : > { %p966_p3 = scmp.lt.s32.totalorder %s964_s17, %s959_s11 }
  0x22   : > { %p962_p12 = pnand %p961_p10, %p960_p2 }
  0x23   : > { %p967_p5 = por %p966_p3, %p965_p0 }
  0x24   : > { %p963_p13 = pneg %p962_p12 }
  0x26   : > { %p968_p11 = pnand %p967_p5, %p963_p13 }
  0x28   : > { %971 = shalt.err (!%p968_p11)
}
  0x29   : > { %s1154_s14 = smov 64   ;;  %s1155_s30 = smov 4  }
  0x2a   : > { %870 = dma.hbm_to_vmem [thread:$0]  (!%p1268_p9), %s223_s28, 128, %s225_s6, %s213_s9, %s1154_s14, %s1154_s14, %s1155_s30  }
  0x2b   : > { %236 = sbr.rel (%p1233_p8) target bundleno = 268 (0x10c), region = 28  ;;  %s1285_s15 = sand.u32 (!%p1233_p8), 1, %s1141_s19  }
  0x2c   : > { %s1288_s16 = sshll.u32 (!%p1233_p8), %s1285_s15, 3  ;;  %s239_s10 = scalar_lea.sflag (!%p1233_p8), [#allocation3], %s1285_s15 }
  0x2d   : > { %s242_s11 = scalar_lea.vmem (!%p1233_p8), [#allocation2], %s1288_s16 }
  0x30   : > { %1116 = dma.done.wait (%p1220_p4), %s239_s10, 128  }
  0x31   : > { %1118 = vsyncadd (%p1220_p4), %s239_s10, 4294967168 }
  0x32   : > { %1120 = dma.done.wait (%p50_p1), [#allocation6], 2048  }
  0x33   : > { %1122 = vsyncadd (%p50_p1), [#allocation6], 4294965248  ;;  %v801_v0 = vld [vmem:[#allocation5 + $0x70] sm:$0xf]  ;;  %v836_v1 = vld [vmem:[#allocation5 + $0x74] sm:$0xf0] }
  0x34   : > { %v835_v2 = vld [vmem:[#allocation5 + $0x74] sm:$0xf]  ;;  %v802_v3 = vor.u32 %v836_v1, %v801_v0  ;;  %v803_v4 = vld [vmem:[#allocation5 + $0x78] sm:$0xf0]  ;;  %v793_v5 = vld [vmem:[#allocation5 + $0x60] sm:$0xf] }
  0x35   : > { %v834_v6 = vld [vmem:[#allocation5 + $0x64] sm:$0xf0]  ;;  %v806_v7 = vor.u32 %v835_v2, %v803_v4  ;;  %v833_v8 = vld [vmem:[#allocation5 + $0x64] sm:$0xf]  ;;  %v795_v9 = vld [vmem:[#allocation5 + $0x68] sm:$0xf0] }
  0x36   : > { %397 = vmatpush.bf16.msra.mxu0 %v802_v3  ;;  %v794_v10 = vor.u32 %v834_v6, %v793_v5  ;;  %v798_v11 = vor.u32 %v833_v8, %v795_v9  ;;  %v785_v12 = vld [vmem:[#allocation5 + $0x50] sm:$0xf]  ;;  %v832_v13 = vld [vmem:[#allocation5 + $0x54] sm:$0xf0]  ;;  %v831_v14 = vld [vmem:[#allocation5 + $0x54] sm:$0xf] }
  0x37   : > { %411 = vmatpush.bf16.msra.mxu1 %v806_v7  ;;  %v787_v15 = vld [vmem:[#allocation5 + $0x58] sm:$0xf0]  ;;  %v786_v16 = vor.u32 %v832_v13, %v785_v12  ;;  %v777_v18 = vld [vmem:[#allocation5 + $0x40] sm:$0xf]  ;;  %v830_v19 = vld [vmem:[#allocation5 + $0x44] sm:$0xf0] }
  0x38   : > { %v790_v17 = vor.u32 %v831_v14, %v787_v15  ;;  %v829_v20 = vld [vmem:[#allocation5 + $0x44] sm:$0xf]  ;;  %v779_v21 = vld [vmem:[#allocation5 + $0x48] sm:$0xf0]  ;;  %v778_v22 = vor.u32 %v830_v19, %v777_v18  ;;  %v769_v24 = vld [vmem:[#allocation5 + $0x30] sm:$0xf] }
  0x39   : > { %v782_v23 = vor.u32 %v829_v20, %v779_v21  ;;  %v828_v25 = vld [vmem:[#allocation5 + $0x34] sm:$0xf0]  ;;  %v827_v26 = vld [vmem:[#allocation5 + $0x34] sm:$0xf]  ;;  %v771_v27 = vld [vmem:[#allocation5 + $0x38] sm:$0xf0] }
  0x3a   : > { %398 = vmatpush.bf16.msra.mxu0 %v794_v10  ;;  %v770_v28 = vor.u32 %v828_v25, %v769_v24  ;;  %v774_v29 = vor.u32 %v827_v26, %v771_v27  ;;  %v761_v30 = vld [vmem:[#allocation5 + $0x20] sm:$0xf]  ;;  %v826_v31 = vld [vmem:[#allocation5 + $0x24] sm:$0xf0]  ;;  %v825_v32 = vld [vmem:[#allocation5 + $0x24] sm:$0xf] }
  0x3b   : > { %412 = vmatpush.bf16.msra.mxu1 %v798_v11  ;;  %v763_v33 = vld [vmem:[#allocation5 + $0x28] sm:$0xf0]  ;;  %v762_v34 = vor.u32 %v826_v31, %v761_v30  ;;  %v753_v36 = vld [vmem:[#allocation5 + $0x10] sm:$0xf]  ;;  %v824_v37 = vld [vmem:[#allocation5 + $0x14] sm:$0xf0] }
  0x3c   : > { %v766_v35 = vor.u32 %v825_v32, %v763_v33  ;;  %v823_v38 = vld [vmem:[#allocation5 + $0x14] sm:$0xf]  ;;  %v755_v39 = vld [vmem:[#allocation5 + $0x18] sm:$0xf0]  ;;  %v754_v40 = vor.u32 %v824_v37, %v753_v36  ;;  %v745_v42 = vld [vmem:[#allocation5] sm:$0xf] }
  0x3d   : > { %v758_v41 = vor.u32 %v823_v38, %v755_v39  ;;  %v822_v43 = vld [vmem:[#allocation5 + $0x4] sm:$0xf0]  ;;  %v821_v44 = vld [vmem:[#allocation5 + $0x4] sm:$0xf]  ;;  %v747_v45 = vld [vmem:[#allocation5 + $0x8] sm:$0xf0] }
  0x3e   : > { %399 = vmatpush.bf16.msra.mxu0 %v786_v16  ;;  %v746_v46 = vor.u32 %v822_v43, %v745_v42  ;;  %v750_v47 = vor.u32 %v821_v44, %v747_v45  ;;  %v820_v48 = vld [vmem:[%s242_s11] sm:$0xff]  ;;  %s837_s24 = sshll.u32 %s1209_s22, 3  ;;  %s268_s29 = scalar_lea.vmem [#allocation7], %s1288_s16 }
  0x3f   : > { %413 = vmatpush.bf16.msra.mxu1 %v790_v17  ;;  %s1304_s28 = sshll.u32 %s268_s29, 4  ;;  %s514_s9 = scalar_lea.hbm %s1418_s3, %s837_s24  ;;  %s499_s28 = int_to_ptr.vmem [resolvable:$true] %s1304_s28 }
  0x40   : > { %s275_s17 = scalar_lea.vmem [#allocation8], %s1288_s16  ;;  %s497_s30 = scalar_lea.hbm %s1417_s2, %s837_s24 }
  0x41   : > { %s1310_s26 = sshll.u32 %s275_s17, 4  ;;  %s475_s10 = sand.u32 1, %s1209_s22   ;;  %s516_s26 = int_to_ptr.vmem [resolvable:$true] %s1310_s26 }
  0x42   : > { %400 = vmatpush.bf16.msra.mxu0 %v778_v22  ;;  %s517_s11 = sshll.u32 %s514_s9, 4  ;;  %s500_s23 = sshll.u32 %s497_s30, 4  ;;  %s1318_s11 = int_to_ptr.hbm [resolvable:$true] %s517_s11  ;;  %s1320_s23 = int_to_ptr.hbm [resolvable:$true] %s500_s23 }
  0x43   : > { %414 = vmatpush.bf16.msra.mxu1 %v782_v23  ;;  %s1323_s24 = scalar_lea.sflag [#allocation9], %s475_s10  ;;  %s1001_s6 = sshra.s32 %s1318_s11, 4  ;;  %s1002_s6 = int_to_ptr.hbm [resolvable:$true] %s1001_s6 }
  0x44   : > { %s1003_s8 = scalar_lea.hbm %s1002_s6, 8  ;;  %s1007_s27 = scalar_lea.hbm %s1418_s3, 16 }
  0x45   : > { %p1004_p1 = scmp.ne.s32.totalorder %s1002_s6, %s1003_s8  ;;  %p1008_p11 = scmp.lt.s32.totalorder %s1002_s6, %s1418_s3 }
  0x46   : > { %401 = vmatpush.bf16.msra.mxu0 %v770_v28  ;;  %p1009_p9 = scmp.lt.s32.totalorder %s1007_s27, %s1003_s8 }
  0x47   : > { %415 = vmatpush.bf16.msra.mxu1 %v774_v29  ;;  %p1005_p4 = pnand %p1004_p1, %p1257_p7 }
  0x48   : > { %p1010_p2 = por %p1009_p9, %p1008_p11 }
  0x49   : > { %p1006_p8 = pneg %p1005_p4 }
  0x4a   : > { %402 = vmatpush.bf16.msra.mxu0 %v762_v34 }
  0x4b   : > { %416 = vmatpush.bf16.msra.mxu1 %v766_v35  ;;  %p1011_p10 = pnand %p1010_p2, %p1006_p8 }
  0x4e   : > { %403 = vmatpush.bf16.msra.mxu0 %v754_v40 }
  0x4f   : > { %417 = vmatpush.bf16.msra.mxu1 %v758_v41 }
  0x52   : > { %404 = vmatpush.bf16.msra.mxu0 %v746_v46 }
  0x53   : > { %418 = vmatpush.bf16.msra.mxu1 %v750_v47 }
  0x55   : > { %405 = vmatmul.bf16.vlgmr.msra.gmra.mxu0 %v820_v48 }
  0x56   : > { %419 = vmatmul.bf16.vlgmr.msra.gmra.mxu1 %v820_v48 }
  0xd2   : > { %v406_v49 = vpop.f32.mrf.mxu0 }
  0xd3   : > { %v420_v50 = vpop.f32.mrf.mxu1  ;;  %v440_v52 = vmul.f32 %v406_v49, %v406_v49 }
  0xd4   : > { %v459_v57 = vmul.f32 %v420_v50, %v420_v50 }
  0xda   : > { %v408_v51 = vpop.f32.mrf.mxu0 }
  0xdb   : > { %v842_v53 = vpack.c.bf16 %v408_v51, %v406_v49  ;;  %v433_v54 = vadd.f32 %v408_v51, %v406_v49  ;;  %v441_v55 = vmul.f32 %v408_v51, %v408_v51  ;;  %v422_v56 = vpop.f32.mrf.mxu1 }
  0xdc   : > { %v847_v58 = vpack.c.bf16 %v422_v56, %v420_v50  ;;  %v452_v59 = vadd.f32 %v422_v56, %v420_v50  ;;  %v460_v60 = vmul.f32 %v422_v56, %v422_v56 }
  0xdd   : > { %843 = vst [vmem:[%s268_s29] sm:$0xff] %v842_v53   ;;  %v434_v61 = vrot.slane %v433_v54, 4  ;;  %v442_v62 = vadd.f32 %v441_v55, %v440_v52 }
  0xde   : > { %848 = vst [vmem:[%s275_s17] sm:$0xff] %v847_v58   ;;  %v453_v63 = vrot.slane %v452_v59, 4  ;;  %v461_v0 = vadd.f32 %v460_v60, %v459_v57 }
  0xdf   : > { %v435_v1 = vadd.f32 %v434_v61, %v433_v54  ;;  %v443_v2 = vrot.slane %v442_v62, 4 }
  0xe0   : > { %1014 = shalt.err (!%p1011_p10)
}
  0xe1   : > { %s1156_s30 = smov 64   ;;  %s1157_s10 = smov 4   ;;  %v454_v3 = vadd.f32 %v453_v63, %v452_v59  ;;  %v462_v4 = vrot.slane %v461_v0, 4 }
  0xe2   : > { %856 = dma.vmem_to_hbm [thread:$0]  (%p1257_p7), %s516_s26, 128, %s1318_s11, %s1323_s24, %s1156_s30, %s1156_s30, %s1157_s10  }
  0xe3   : > { %s471_s29 = scalar_lea.sflag [#allocation4], %s1285_s15  ;;  %s1029_s6 = sshra.s32 %s1320_s23, 4  ;;  %s1030_s6 = int_to_ptr.hbm [resolvable:$true] %s1029_s6 }
  0xe4   : > { %s1031_s8 = scalar_lea.hbm %s1030_s6, 8  ;;  %s1035_s14 = scalar_lea.hbm %s1417_s2, 16 }
  0xe5   : > { %p1032_p12 = scmp.ne.s32.totalorder %s1030_s6, %s1031_s8  ;;  %p1036_p3 = scmp.lt.s32.totalorder %s1030_s6, %s1417_s2 }
  0xe6   : > { %p1037_p5 = scmp.lt.s32.totalorder %s1035_s14, %s1031_s8 }
  0xe7   : > { %p1033_p13 = pnand %p1032_p12, %p1257_p7 }
  0xe8   : > { %p1038_p1 = por %p1037_p5, %p1036_p3 }
  0xe9   : > { %p1034_p0 = pneg %p1033_p13 }
  0xeb   : > { %p1039_p4 = pnand %p1038_p1, %p1034_p0 }
  0xed   : > { %1042 = shalt.err (!%p1039_p4)
}
  0xee   : > { %855 = dma.vmem_to_hbm [thread:$0]  (%p1257_p7), %s499_s28, 128, %s1320_s23, %s471_s29, %s1156_s30, %s1156_s30, %s1157_s10   ;;  %v436_v5 = vrot.slane %v435_v1, 2  ;;  %v444_v6 = vadd.f32 %v443_v2, %v442_v62  ;;  %v455_v7 = vrot.slane %v454_v3, 2  ;;  %v463_v8 = vadd.f32 %v462_v4, %v461_v0 }
  0xef   : > { %s815_s26 = sshll.u32 %s1209_s22, 1  ;;  %s1427_s22 = sshll.u32 %s1285_s15, 1  ;;  %vm449_vm0 = vcmask 1040384  }
  0xf0   : > { %v437_v9 = vadd.f32 %v436_v5, %v435_v1  ;;  %v445_v10 = vrot.slane %v444_v6, 2  ;;  %v456_v11 = vadd.f32 %v455_v7, %v454_v3  ;;  %v464_v12 = vrot.slane %v463_v8, 2  ;;  %s530_s6 = scalar_lea.hbm %s1419_s4, %s815_s26  ;;  %s544_s23 = scalar_lea.hbm %s1420_s5, %s815_s26 }
  0xf1   : > { %s282_s28 = scalar_lea.vmem [#allocation10], %s1427_s22  ;;  %s534_s10 = sshll.u32 %s530_s6, 4  ;;  %s535_s10 = int_to_ptr.hbm [resolvable:$true] %s534_s10 }
  0xf2   : > { %v438_v13 = vrot.slane %v437_v9, 1  ;;  %v446_v14 = vadd.f32 %v445_v10, %v444_v6  ;;  %v457_v15 = vrot.slane %v456_v11, 1  ;;  %v465_v16 = vadd.f32 %v464_v12, %v463_v8  ;;  %s532_s30 = sshll.u32 %s282_s28, 4  ;;  %s1428_s29 = smov %s1427_s22  ;;  %s533_s30 = int_to_ptr.vmem [resolvable:$true] %s532_s30 }
  0xf3   : > { %s289_s27 = scalar_lea.vmem [#allocation11], %s1428_s29  ;;  %s548_s17 = sshll.u32 %s544_s23, 4  ;;  %s1368_s17 = int_to_ptr.hbm [resolvable:$true] %s548_s17 }
  0xf4   : > { %v447_v17 = vrot.slane %v446_v14, 1  ;;  %v466_v18 = vrot.slane %v465_v16, 1  ;;  %s546_s14 = sshll.u32 %s289_s27, 4  ;;  %v439_v19 = vadd.f32 %v438_v13, %v437_v9  ;;  %v458_v21 = vadd.f32 %v457_v15, %v456_v11  ;;  %s1057_s26 = sshra.s32 %s535_s10, 4  ;;  %s1366_s14 = int_to_ptr.vmem [resolvable:$true] %s546_s14  ;;  %s1058_s26 = int_to_ptr.hbm [resolvable:$true] %s1057_s26 }
  0xf5   : > { %s1059_s11 = scalar_lea.hbm %s1058_s26, 2  ;;  %s1063_s8 = scalar_lea.hbm %s1419_s4, 4 }
  0xf6   : > { %v448_v20 = vadd.f32 %v447_v17, %v446_v14  ;;  %v467_v22 = vadd.f32 %v466_v18, %v465_v16  ;;  %p1060_p8 = scmp.ne.s32.totalorder %s1058_s26, %s1059_s11  ;;  %p1064_p2 = scmp.lt.s32.totalorder %s1058_s26, %s1419_s4 }
  0xf7   : > { %p1065_p10 = scmp.lt.s32.totalorder %s1063_s8, %s1059_s11 }
  0xf8   : > { %v450_v23 = vsel %vm449_vm0, %v439_v19, %v448_v20  ;;  %v468_v24 = vsel %vm449_vm0, %v458_v21, %v467_v22  ;;  %p1061_p11 = pnand %p1060_p8, %p1257_p7 }
  0xf9   : > { %451 = vst [vmem:[%s282_s28] sm:$0x3] %v450_v23  ;;  %p1066_p12 = por %p1065_p10, %p1064_p2 }
  0xfa   : > { %p1062_p9 = pneg %p1061_p11 }
  0xfc   : > { %p1067_p13 = pnand %p1066_p12, %p1062_p9 }
  0xfe   : > { %1070 = shalt.err (!%p1067_p13)
}
  0xff   : > { %857 = dma.vmem_to_hbm [thread:$0]  (%p1257_p7), %s533_s30, 32, %s535_s10, %s1323_s24   ;;  %469 = vst [vmem:[%s289_s27] sm:$0x3] %v468_v24 }
 0x100   : > { %s486_s22 = scalar_lea.sflag [#allocation12], %s1285_s15  ;;  %s1085_s28 = sshra.s32 %s1368_s17, 4  ;;  %s1086_s28 = int_to_ptr.hbm [resolvable:$true] %s1085_s28 }
 0x101   : > { %s1087_s29 = scalar_lea.hbm %s1086_s28, 2  ;;  %s1091_s16 = scalar_lea.hbm %s1420_s5, 4 }
 0x102   : > { %p1088_p0 = scmp.ne.s32.totalorder %s1086_s28, %s1087_s29  ;;  %p1092_p1 = scmp.lt.s32.totalorder %s1086_s28, %s1420_s5 }
 0x103   : > { %p1093_p4 = scmp.lt.s32.totalorder %s1091_s16, %s1087_s29 }
 0x104   : > { %p1089_p3 = pnand %p1088_p0, %p1257_p7 }
 0x105   : > { %p1094_p8 = por %p1093_p4, %p1092_p1 }
 0x106   : > { %p1090_p5 = pneg %p1089_p3 }
 0x108   : > { %p1095_p11 = pnand %p1094_p8, %p1090_p5 }
 0x10a   : > { %1098 = shalt.err (!%p1095_p11)
}
 0x10b   : > { %858 = dma.vmem_to_hbm [thread:$0]  (%p1257_p7), %s1366_s14, 32, %s1368_s17, %s486_s22  }
 0x10c PF: > { %s560_s15 = sand.u32 1, %s1137_s18   ;;  %p1429_p9 = scmp.ge.s32.totalorder %s1149_s21, 2 }
 0x10d   : > { %s561_s24 = scalar_lea.sflag [#allocation4], %s560_s15 }
 0x10e   : > { %p872_p2 = pnand %p1429_p9, %p1225_p6 }
 0x110   : > { %p873_p10 = pneg %p872_p2 }
 0x112   : > { %1124 = dma.done.wait (%p873_p10), %s561_s24, 128  }
 0x113   : > { %1126 = vsyncadd (%p873_p10), %s561_s24, 4294967168  ;;  %s1430_s30 = sadd.s32 4294967294, %s1149_s21  }
 0x114   : > { %s570_s10 = sand.u32 1, %s1430_s30  }
 0x115   : > { %s571_s27 = scalar_lea.sflag [#allocation9], %s570_s10 }
 0x116   : > { %1128 = dma.done.wait (%p873_p10), %s571_s27, 160  }
 0x117   : > { %1130 = vsyncadd (%p873_p10), %s571_s27, 4294967136  ;;  %s591_s13 = scalar_lea.sflag [#allocation12], %s560_s15 }
 0x118   : > { %1132 = dma.done.wait (%p873_p10), %s591_s13, 32  }
 0x119   : > { %1134 = vsyncadd (%p873_p10), %s591_s13, 4294967264  ;;  %p26_p7 = scmp.ge.s32.totalorder %s1243_s7, 4   ;;  %s1431_s18 = smov %s1141_s19 }
 0x11a   : > { %s1432_s19 = smov %s1145_s20  ;;  %s1433_s20 = smov %s1253_s12 }
 0x11b   : > { %s1434_s21 = smov %s1243_s7  ;;  %28 = sbr.rel (!%p26_p7) target bundleno = 10 (0xa), region = 126 }
 0x120   :  { %597 = vsyncpa [#allocation3], 1 }
 0x121   :  { %599 = vsyncpa [#allocation3 + $0x1], 1 }
 0x122   :  { %600 = vsyncpa [#allocation6], 1 }
 0x123   :  { %601 = vsyncpa [#allocation4], 1 }
 0x124   :  { %603 = vsyncpa [#allocation4 + $0x1], 1 }
 0x125   :  { %604 = vsyncpa [#allocation9], 1 }
 0x126   :  { %606 = vsyncpa [#allocation9 + $0x1], 1 }
 0x127   :  { %607 = vsyncpa [#allocation12], 1 }
 0x128   :  { %609 = vsyncpa [#allocation12 + $0x1], 1 }

</bundles_post_ra>
